<compile_context>
chip_gen: v5e
topology: v5e:2x2
jax: 0.10.0
libtpu: 0.0.40
codegen_flags: <defaults>
</compile_context>

<pallas_src>
import functools

import jax
import jax.numpy as jnp
from jax.experimental import pallas as pl
from jax.experimental.pallas import tpu as pltpu

EPS = 1e-5
_VMEM_LIMIT_BYTES = 40 * 1024 * 1024   # > default scoped limits, < v7x 64 MiB


def _round_up(x, m):
    return (x + m - 1) // m * m


def _pick_tile(hw, b, c, itemsize, max_block_bytes, max_tile_lanes):
    """Largest multiple-of-128 spatial tile with one (B, C, T) block under
    max_block_bytes. The grid is cdiv(HW, T) with in-kernel tail masking, so T
    never has to divide HW."""
    max_tile_lanes = max(128, (max_tile_lanes // 128) * 128)
    hw_pad = _round_up(hw, 128)
    t_cap = (max_block_bytes // max(1, b * c * itemsize)) // 128 * 128
    return max(128, min(max(t_cap, 128), max_tile_lanes, hw_pad))


# --------------------------------------------------------------------------- #
# Phase A: per-slice masked partial sums of x over the spatial axis.
# --------------------------------------------------------------------------- #
def _partial_sum_kernel(x_ref, part_ref, acc_ref, *, hw, tiles_per_slice,
                        vpu_acc):
    # x_ref: (B, C, T)   part_ref: (1, B, C)   acc_ref: (B, C, 128) or (B, C)
    s = pl.program_id(0)          # slice ("parallel" -> per-TC on v7x)
    t = pl.program_id(1)          # tile within slice ("arbitrary", sequential)
    nb, nc, tile = x_ref.shape
    n_chunks = tile // 128

    @pl.when(t == 0)
    def _():
        acc_ref[...] = jnp.zeros_like(acc_ref)

    # Global element offset of this tile. For the clamped overhang iterations
    # of the last slice this lies past HW and everything masks to zero.
    base = (s * tiles_per_slice + t) * tile
    lane = jax.lax.broadcasted_iota(jnp.int32, (nb, nc, 128), 2)

    # Aligned 128-lane chunks, masked tail, accumulated on the VPU.
    for i in range(n_chunks):
        chunk = x_ref[:, :, i * 128:(i + 1) * 128].astype(jnp.float32)
        valid = lane < (hw - base - i * 128)
        masked = jnp.where(valid, chunk, 0.0)
        if vpu_acc:
            acc_ref[...] += masked                       # pure VPU adds
        else:
            acc_ref[...] += jnp.sum(masked, axis=-1)     # fallback (large B*C)

    @pl.when(t == tiles_per_slice - 1)
    def _():
        total = jnp.sum(acc_ref[...], axis=-1) if vpu_acc else acc_ref[...]
        part_ref[...] = total[None]                      # (1, B, C)


# --------------------------------------------------------------------------- #
# Phase A2: combine partials + MLP + BatchNorm(training) + ReLU -> (B, C) gate.
# --------------------------------------------------------------------------- #
def _gate_mlp_kernel(part_ref, w1t_ref, g1_ref, b1_ref, w2t_ref, g2_ref,
                     b2_ref, gate_ref, *, inv_hw):
    pooled = jnp.sum(part_ref[...], axis=0) * inv_hw                 # (B, C)

    h = jnp.dot(pooled, w1t_ref[...], preferred_element_type=jnp.float32)
    mu1 = jnp.mean(h, axis=0, keepdims=True)
    var1 = jnp.mean((h - mu1) * (h - mu1), axis=0, keepdims=True)
    h = (h - mu1) * jax.lax.rsqrt(var1 + EPS)
    h = jnp.maximum(h * g1_ref[...] + b1_ref[...], 0.0)

    g = jnp.dot(h, w2t_ref[...], preferred_element_type=jnp.float32)
    mu2 = jnp.mean(g, axis=0, keepdims=True)
    var2 = jnp.mean((g - mu2) * (g - mu2), axis=0, keepdims=True)
    g = (g - mu2) * jax.lax.rsqrt(var2 + EPS)
    g = jnp.maximum(g * g2_ref[...] + b2_ref[...], 0.0)

    gate_ref[...] = g.astype(gate_ref.dtype)


# --------------------------------------------------------------------------- #
# Phase B: lane-dense write phase (expand_as broadcast, or fused BAM epilogue).
# --------------------------------------------------------------------------- #
def _broadcast_kernel(gate_ref, o_ref):
    # Module semantics: expanded gate; x is never re-read.
    o_ref[...] = jnp.broadcast_to(gate_ref[...][:, :, None],
                                  o_ref.shape).astype(o_ref.dtype)


def _bam_fused_kernel(gate_ref, x_ref, o_ref):
    # Fused consumer: x * (1 + sigmoid(gate)) -- saves a full-tensor HBM
    # round-trip of the expanded gate. sigmoid -> EUP slot, multiply -> VPU.
    scale = 1.0 + jax.nn.sigmoid(gate_ref[...])
    o_ref[...] = (x_ref[...].astype(jnp.float32)
                  * scale[:, :, None]).astype(o_ref.dtype)


# --------------------------------------------------------------------------- #
# Wrapper
# --------------------------------------------------------------------------- #
def channel_gate(x, w1, gamma1, beta1, w2, gamma2, beta2, *,
                 output="expand", max_block_bytes=6 << 20,
                 max_tile_lanes=4096):
    """ChannelGate forward.

    x: (B, C, H, W), any float dtype (f32 / bf16). Weights in PyTorch
    (out_features, in_features) layout.
      output="expand" -> (B, C, H, W) expanded gate (matches the nn.Module)
      output="gate"   -> (B, C) gate (for a consumer that fuses it itself)
      output="bam"    -> (B, C, H, W) fused x * (1 + sigmoid(gate))
    """
    assert output in ("expand", "gate", "bam")
    B, C, H, W = x.shape
    Cr = w1.shape[0]
    HW = H * W
    itemsize = jnp.dtype(x.dtype).itemsize

    T = _pick_tile(HW, B, C, itemsize, max_block_bytes, max_tile_lanes)
    num_tiles = pl.cdiv(HW, T)
    num_slices = 2 if num_tiles >= 2 else 1
    tps = pl.cdiv(num_tiles, num_slices)       # tiles per slice

    x_flat = x.reshape(B, C, HW)
    w1t = w1.T.astype(jnp.float32)             # (C, Cr), pre-transposed
    w2t = w2.T.astype(jnp.float32)             # (Cr, C)
    g1 = gamma1.reshape(1, Cr).astype(jnp.float32)
    b1 = beta1.reshape(1, Cr).astype(jnp.float32)
    g2 = gamma2.reshape(1, C).astype(jnp.float32)
    b2 = beta2.reshape(1, C).astype(jnp.float32)

    # (B, C, 128) VPU accumulator unless it would be too large.
    vpu_acc = B * C * 128 * 4 <= (8 << 20)
    acc_shape = (B, C, 128) if vpu_acc else (B, C)

    # --- Phase A: per-slice masked partial sums ------------------------------
    partials = pl.pallas_call(
        functools.partial(_partial_sum_kernel, hw=HW, tiles_per_slice=tps,
                          vpu_acc=vpu_acc),
        out_shape=jax.ShapeDtypeStruct((num_slices, B, C), jnp.float32),
        grid=(num_slices, tps),
        in_specs=[pl.BlockSpec(
            (B, C, T),
            lambda s, t: (0, 0, jnp.minimum(s * tps + t, num_tiles - 1)))],
        out_specs=pl.BlockSpec((1, B, C), lambda s, t: (s, 0, 0)),
        scratch_shapes=[pltpu.VMEM(acc_shape, jnp.float32)],
        compiler_params=pltpu.CompilerParams(
            dimension_semantics=("parallel", "arbitrary"),
            vmem_limit_bytes=_VMEM_LIMIT_BYTES),
    )(x_flat)

    # --- Phase A2: tiny gate MLP (grid-less; everything fits in VMEM) --------
    gate = pl.pallas_call(
        functools.partial(_gate_mlp_kernel, inv_hw=1.0 / HW),
        out_shape=jax.ShapeDtypeStruct((B, C), jnp.float32),
    )(partials, w1t, g1, b1, w2t, g2, b2)

    if output == "gate":
        return gate

    # --- Phase B: lane-dense tiled write ("parallel" -> megacore on v7x) -----
    out_spec = pl.BlockSpec((B, C, T), lambda t: (0, 0, t))
    gate_spec = pl.BlockSpec((B, C), lambda t: (0, 0))
    cp = pltpu.CompilerParams(dimension_semantics=("parallel",),
                              vmem_limit_bytes=_VMEM_LIMIT_BYTES)

    if output == "expand":
        out = pl.pallas_call(
            _broadcast_kernel,
            out_shape=jax.ShapeDtypeStruct((B, C, HW), x.dtype),
            grid=(num_tiles,),
            in_specs=[gate_spec],
            out_specs=out_spec,
            compiler_params=cp,
        )(gate)
    else:  # "bam": fused x * (1 + sigmoid(gate))
        out = pl.pallas_call(
            _bam_fused_kernel,
            out_shape=jax.ShapeDtypeStruct((B, C, HW), x.dtype),
            grid=(num_tiles,),
            in_specs=[gate_spec, pl.BlockSpec((B, C, T), lambda t: (0, 0, t))],
            out_specs=out_spec,
            compiler_params=cp,
        )(gate, x_flat)

    return out.reshape(B, C, H, W)


# --------------------------------------------------------------------------- #
# Pure-JAX reference (training-mode BatchNorm, like the nn.Module default).
# --------------------------------------------------------------------------- #
def _reference_gate(x, w1, gamma1, beta1, w2, gamma2, beta2):
    pooled = jnp.mean(x.astype(jnp.float32), axis=(2, 3))
    h = jnp.dot(pooled, w1.T, precision=jax.lax.Precision.HIGHEST)
    h = (h - h.mean(0)) * jax.lax.rsqrt(h.var(0) + EPS) * gamma1 + beta1
    h = jnp.maximum(h, 0.0)
    g = jnp.dot(h, w2.T, precision=jax.lax.Precision.HIGHEST)
    g = (g - g.mean(0)) * jax.lax.rsqrt(g.var(0) + EPS) * gamma2 + beta2
    return jnp.maximum(g, 0.0)


if __name__ == "__main__":
    def _check(name, got, want, tol=1e-4):
        assert got.shape == want.shape, (name, got.shape, want.shape)
        ok = jnp.allclose(got.astype(jnp.float32), want.astype(jnp.float32),
                          atol=tol, rtol=tol)
        assert bool(ok), f"{name} mismatch"

    key = jax.random.PRNGKey(0)

    def make_params(k, C, Cr):
        k1, k2, k3, k4, k5, k6 = jax.random.split(k, 6)
        w1 = jax.random.normal(k1, (Cr, C), jnp.float32) * (1.0 / C ** 0.5)
        w2 = jax.random.normal(k2, (C, Cr), jnp.float32) * (1.0 / Cr ** 0.5)
        gamma1 = 1.0 + 0.1 * jax.random.normal(k3, (Cr,), jnp.float32)
        beta1 = 0.1 * jax.random.normal(k4, (Cr,), jnp.float32)
        gamma2 = 1.0 + 0.1 * jax.random.normal(k5, (C,), jnp.float32)
        beta2 = 0.1 * jax.random.normal(k6, (C,), jnp.float32)
        return w1, gamma1, beta1, w2, gamma2, beta2

    # ---- Case 1: gate_channel=32, reduction=4, 16x16 spatial ---------------
    B, C, H, W = 2, 32, 16, 16
    Cr = C // 4
    kx, kp, key = jax.random.split(key, 3)
    x = jax.random.normal(kx, (B, C, H, W), jnp.float32)
    params = make_params(kp, C, Cr)

    g_ref = _reference_gate(x, *params)

    out = channel_gate(x, *params)                       # module semantics
    jax.block_until_ready(out)
    _check("expand", out, jnp.broadcast_to(g_ref[:, :, None, None], x.shape))

    gate = channel_gate(x, *params, output="gate")
    _check("gate", gate, g_ref)

    bam = channel_gate(x, *params, output="bam")
    _check("bam", bam, x * (1.0 + jax.nn.sigmoid(g_ref))[:, :, None, None])

    # ---- Case 2: HW=361 (not a multiple of 128) with a forced 128-lane tile.
    # Exercises the masked tail, multi-tile grid and the 2-slice parallel split
    # (3 tiles -> 2 slices of 2, the overhang iteration is fully masked).
    B, C, H, W = 2, 16, 19, 19
    Cr = C // 4
    kx, kp, key = jax.random.split(key, 3)
    x = jax.random.normal(kx, (B, C, H, W), jnp.float32)
    params = make_params(kp, C, Cr)

    g_ref = _reference_gate(x, *params)
    out = channel_gate(x, *params, max_tile_lanes=128)
    jax.block_until_ready(out)
    _check("expand_masked_tail", out,
           jnp.broadcast_to(g_ref[:, :, None, None], x.shape))

    print("KERNEL_OK")
</pallas_src>

<mosaic_0001>
module attributes {stable_mosaic.version = 11 : i64} {
  func.func @_partial_sum_kernel(%arg0: i32, %arg1: i32, %arg2: memref<2x32x256xf32, #tpu.memory_space<vmem>>, %arg3: memref<1x2x32xf32, #tpu.memory_space<vmem>>, %arg4: memref<2x32x128xf32, #tpu.memory_space<vmem>>) attributes {dimension_semantics = [#tpu.dimension_semantics<parallel>, #tpu.dimension_semantics<arbitrary>], iteration_bounds = array<i64: 1, 1>, scalar_prefetch = 0 : i64, scratch_operands = 1 : i64, tpu.core_type = #tpu.core_type<tc>, window_params = [{transform_indices = @transform_0, window_bounds = array<i64: 2, 32, 256>}, {transform_indices = @transform_1, window_bounds = array<i64: 1, 2, 32>}]} {
    %c0_i32 = arith.constant 0 : i32
    %0 = arith.cmpi eq, %arg1, %c0_i32 : i32
    %1 = arith.extui %0 : i1 to i32
    %c0_i32_0 = arith.constant 0 : i32
    %2 = arith.cmpi ne, %1, %c0_i32_0 : i32
    scf.if %2 {
      %cst_23 = arith.constant 0.000000e+00 : f32
      %30 = vector.broadcast %cst_23 : f32 to vector<2x32x128xf32>
      %c0_24 = arith.constant 0 : index
      %c0_25 = arith.constant 0 : index
      %c0_26 = arith.constant 0 : index
      %31 = vector.load %arg4[%c0_24, %c0_25, %c0_26] : memref<2x32x128xf32, #tpu.memory_space<vmem>>, vector<2x32x128xf32>
      tpu.vector_store %arg4[%c0_24, %c0_25, %c0_26], %30 {strides = array<i32>} : memref<2x32x128xf32, #tpu.memory_space<vmem>>, vector<2x32x128xf32>,
    } else {
    }
    %c1_i32 = arith.constant 1 : i32
    %3 = arith.muli %arg0, %c1_i32 : i32
    %4 = arith.addi %3, %arg1 : i32
    %c256_i32 = arith.constant 256 : i32
    %5 = arith.muli %4, %c256_i32 : i32
    %6 = tpu.iota {dimensions = array<i32: 2>} : vector<2x32x128xi32>
    %c0 = arith.constant 0 : index
    %c0_1 = arith.constant 0 : index
    %c0_2 = arith.constant 0 : index
    %7 = vector.load %arg2[%c0, %c0_1, %c0_2] : memref<2x32x256xf32, #tpu.memory_space<vmem>>, vector<2x32x128xf32>
    %c256_i32_3 = arith.constant 256 : i32
    %8 = arith.subi %c256_i32_3, %5 : i32
    %c0_i32_4 = arith.constant 0 : i32
    %9 = arith.subi %8, %c0_i32_4 : i32
    %10 = vector.broadcast %9 : i32 to vector<2x32x128xi32>
    %11 = arith.cmpi slt, %6, %10 : vector<2x32x128xi32>
    %cst = arith.constant 0.000000e+00 : f32
    %12 = vector.broadcast %cst : f32 to vector<2x32x128xf32>
    %13 = arith.select %11, %7, %12 : vector<2x32x128xi1>, vector<2x32x128xf32>
    %c0_5 = arith.constant 0 : index
    %c0_6 = arith.constant 0 : index
    %c0_7 = arith.constant 0 : index
    %14 = vector.load %arg4[%c0_5, %c0_6, %c0_7] : memref<2x32x128xf32, #tpu.memory_space<vmem>>, vector<2x32x128xf32>
    %15 = arith.addf %14, %13 : vector<2x32x128xf32>
    %c0_8 = arith.constant 0 : index
    %c0_9 = arith.constant 0 : index
    %c0_10 = arith.constant 0 : index
    %16 = vector.load %arg4[%c0_8, %c0_9, %c0_10] : memref<2x32x128xf32, #tpu.memory_space<vmem>>, vector<2x32x128xf32>
    tpu.vector_store %arg4[%c0_8, %c0_9, %c0_10], %15 {strides = array<i32>} : memref<2x32x128xf32, #tpu.memory_space<vmem>>, vector<2x32x128xf32>,
    %c0_11 = arith.constant 0 : index
    %c0_12 = arith.constant 0 : index
    %c128 = arith.constant 128 : index
    %17 = vector.load %arg2[%c0_11, %c0_12, %c128] : memref<2x32x256xf32, #tpu.memory_space<vmem>>, vector<2x32x128xf32>
    %c256_i32_13 = arith.constant 256 : i32
    %18 = arith.subi %c256_i32_13, %5 : i32
    %c128_i32 = arith.constant 128 : i32
    %19 = arith.subi %18, %c128_i32 : i32
    %20 = vector.broadcast %19 : i32 to vector<2x32x128xi32>
    %21 = arith.cmpi slt, %6, %20 : vector<2x32x128xi32>
    %cst_14 = arith.constant 0.000000e+00 : f32
    %22 = vector.broadcast %cst_14 : f32 to vector<2x32x128xf32>
    %23 = arith.select %21, %17, %22 : vector<2x32x128xi1>, vector<2x32x128xf32>
    %c0_15 = arith.constant 0 : index
    %c0_16 = arith.constant 0 : index
    %c0_17 = arith.constant 0 : index
    %24 = vector.load %arg4[%c0_15, %c0_16, %c0_17] : memref<2x32x128xf32, #tpu.memory_space<vmem>>, vector<2x32x128xf32>
    %25 = arith.addf %24, %23 : vector<2x32x128xf32>
    %c0_18 = arith.constant 0 : index
    %c0_19 = arith.constant 0 : index
    %c0_20 = arith.constant 0 : index
    %26 = vector.load %arg4[%c0_18, %c0_19, %c0_20] : memref<2x32x128xf32, #tpu.memory_space<vmem>>, vector<2x32x128xf32>
    tpu.vector_store %arg4[%c0_18, %c0_19, %c0_20], %25 {strides = array<i32>} : memref<2x32x128xf32, #tpu.memory_space<vmem>>, vector<2x32x128xf32>,
    %c0_i32_21 = arith.constant 0 : i32
    %27 = arith.cmpi eq, %arg1, %c0_i32_21 : i32
    %28 = arith.extui %27 : i1 to i32
    %c0_i32_22 = arith.constant 0 : i32
    %29 = arith.cmpi ne, %28, %c0_i32_22 : i32
    scf.if %29 {
      %c0_23 = arith.constant 0 : index
      %c0_24 = arith.constant 0 : index
      %c0_25 = arith.constant 0 : index
      %30 = vector.load %arg4[%c0_23, %c0_24, %c0_25] : memref<2x32x128xf32, #tpu.memory_space<vmem>>, vector<2x32x128xf32>
      %cst_26 = arith.constant dense<0.000000e+00> : vector<2x32xf32>
      %31 = vector.multi_reduction <add>, %30, %cst_26 [2] : vector<2x32x128xf32> to vector<2x32xf32>
      %32 = vector.shape_cast %31 : vector<2x32xf32> to vector<1x2x32xf32>
      %c0_27 = arith.constant 0 : index
      %c0_28 = arith.constant 0 : index
      %c0_29 = arith.constant 0 : index
      %33 = vector.load %arg3[%c0_27, %c0_28, %c0_29] : memref<1x2x32xf32, #tpu.memory_space<vmem>>, vector<1x2x32xf32>
      tpu.vector_store %arg3[%c0_27, %c0_28, %c0_29], %32 {strides = array<i32>} : memref<1x2x32xf32, #tpu.memory_space<vmem>>, vector<1x2x32xf32>,
    } else {
    }
    return
  }
  func.func @transform_0(%arg0: i32, %arg1: i32) -> (i32, i32, i32) {
    %c1_i32 = arith.constant 1 : i32
    %0 = arith.muli %arg0, %c1_i32 : i32
    %1 = arith.addi %0, %arg1 : i32
    %c0_i32 = arith.constant 0 : i32
    %2 = arith.minsi %1, %c0_i32 : i32
    %c0_i32_0 = arith.constant 0 : i32
    %c0_i32_1 = arith.constant 0 : i32
    %c0_i32_2 = arith.constant 0 : i32
    return %c0_i32_0, %c0_i32_1, %2 : i32, i32, i32
  }
  func.func @transform_1(%arg0: i32, %arg1: i32) -> (i32, i32, i32) {
    %c0_i32 = arith.constant 0 : i32
    %c0_i32_0 = arith.constant 0 : i32
    %c0_i32_1 = arith.constant 0 : i32
    return %arg0, %c0_i32, %c0_i32_0 : i32, i32, i32
  }
}

</mosaic_0001>

<bundles_post_ra>
// kernel: tpu_custom_call.1
= control target key start
LH: loop header
LB: loop body
LE: loop exit
PB: predicated region body
PF: predicated region fallthrough
CT: control target
= control target key end

     0   :  { %6 = vsyncpa [#allocation4], 0  ;;  %s292_s0 = inlined_call_operand.hbm [shape: f32[2,32,256], index: 0, kind: input, shape index: {}]   ;;  %s293_s1 = inlined_call_operand.hbm [shape: f32[1,2,32], index: 1, kind: output, shape index: {}]  }
   0x1   :  { %7 = vsyncpa [#allocation5], 0  ;;  %s18_s8 = sshll.u32 %s292_s0, 4  ;;  %s272_s9 = smov [#allocation3]   ;;  %s19_s8 = int_to_ptr.hbm [resolvable:$true] %s18_s8 }
   0x2   :  { %s20_s10 = sshll.u32 %s272_s9, 4  ;;  %s273_s11 = smov 256   ;;  %s21_s10 = int_to_ptr.vmem [resolvable:$true] %s20_s10 }
   0x3   :  { %s274_s12 = smov 16  }
   0x4   :  { %26 = dma.hbm_to_vmem [thread:$0]  %s19_s8, 2048, %s21_s10, [#allocation4], %s273_s11, %s273_s11, %s274_s12  }
   0x5   :  { %268 = dma.done.wait [#allocation4], 2048  }
   0x6   :  { %269 = vsyncadd [#allocation4], 4294965248  ;;  %v55_v0 = vld [vmem:[#allocation3 + $0x40] sm:$0xff]  ;;  %v98_v1 = vld [vmem:[#allocation3 + $0x48] sm:$0xff]  ;;  %v49_v25 = vlaneseq  ;;  %vm175_vm0 = vcmask 130112   ;;  %vm179_vm1 = vcmask 195712  }
   0x7   :  { %v51_v2 = vld [vmem:[#allocation3] sm:$0xff]  ;;  %v125_v3 = vadd.f32 %v98_v1, %v55_v0  ;;  %v94_v4 = vld [vmem:[#allocation3 + $0x8] sm:$0xff]  ;;  %v56_v9 = vld [vmem:[#allocation3 + $0x50] sm:$0xff]  ;;  %vm183_vm2 = vcmask 261312   ;;  %s275_s0 = smov [#allocation6]   ;;  %s204_s16 = sshll.u32 %s293_s1, 4  ;;  %s205_s16 = int_to_ptr.hbm [resolvable:$true] %s204_s16 }
   0x8   :  { %v53_v5 = vld [vmem:[#allocation3 + $0x20] sm:$0xff]  ;;  %v96_v6 = vld [vmem:[#allocation3 + $0x28] sm:$0xff]  ;;  %v121_v7 = vadd.f32 %v94_v4, %v51_v2  ;;  %v99_v10 = vld [vmem:[#allocation3 + $0x58] sm:$0xff]  ;;  %v50_v28 = vand.u32 127, %v49_v25  ;;  %s202_s13 = sshll.u32 %s275_s0, 4  ;;  %vm192_vm3 = vcmask 1041409   ;;  %s203_s13 = int_to_ptr.vmem [resolvable:$true] %s202_s13 }
   0x9   :  { %v123_v8 = vadd.f32 %v96_v6, %v53_v5  ;;  %156 = vadd.xlane.f32.xlu1 %v125_v3  ;;  %v52_v11 = vld [vmem:[#allocation3 + $0x10] sm:$0xff]  ;;  %v95_v12 = vld [vmem:[#allocation3 + $0x18] sm:$0xff]  ;;  %v57_v13 = vld [vmem:[#allocation3 + $0x60] sm:$0xff]  ;;  %v126_v15 = vadd.f32 %v99_v10, %v56_v9  ;;  %vm195_vm4 = vcmask 254976  }
   0xa   :  { %148 = vadd.xlane.f32.xlu0 %v121_v7  ;;  %v100_v14 = vld [vmem:[#allocation3 + $0x68] sm:$0xff]  ;;  %v122_v16 = vadd.f32 %v95_v12, %v52_v11  ;;  %v58_v18 = vld [vmem:[#allocation3 + $0x70] sm:$0xff]  ;;  %v101_v19 = vld [vmem:[#allocation3 + $0x78] sm:$0xff]  ;;  %v173_v29 = vadd.s32 4294967288, %v50_v28  ;;  %v177_v34 = vadd.s32 4294967280, %v50_v28  ;;  %v181_v37 = vadd.s32 4294967272, %v50_v28 }
   0xb   :  { %152 = vadd.xlane.f32.xlu2 %v123_v8  ;;  %v127_v17 = vadd.f32 %v100_v14, %v57_v13  ;;  %v54_v20 = vld [vmem:[#allocation3 + $0x30] sm:$0xff]  ;;  %v97_v21 = vld [vmem:[#allocation3 + $0x38] sm:$0xff]  ;;  %v128_v22 = vadd.f32 %v101_v19, %v58_v18 }
   0xc   :  { %v124_v23 = vadd.f32 %v97_v21, %v54_v20 }
  0x11   :  { %158 = vadd.xlane.f32.xlu1 %v126_v15 }
  0x12   :  { %150 = vadd.xlane.f32.xlu0 %v122_v16 }
  0x13   :  { %160 = vadd.xlane.f32.xlu2 %v127_v17 }
  0x19   :  { %162 = vadd.xlane.f32.xlu1 %v128_v22 }
  0x1a   :  { %154 = vadd.xlane.f32.xlu0 %v124_v23 }
  0x7c   :  { %v157_v24 = vpop.xlane.xlu1 %156 }
  0x7d   :  { %v149_v26 = vpop.xlane.xlu0 %148  ;;  %v185_v36 = vperm.slane %v157_v24, %v50_v28 }
  0x7e   :  { %v153_v27 = vpop.xlane.xlu2 %152  ;;  %v172_v38 = vperm.slane %v149_v26, %v50_v28 }
  0x7f   :  { %v178_v43 = vperm.slane %v153_v27, %v177_v34 }
  0x84   :  { %v159_v30 = vpop.xlane.xlu1 %158 }
  0x85   :  { %v151_v31 = vpop.xlane.xlu0 %150  ;;  %v186_v32 = vperm.slane %v159_v30, %v173_v29 }
  0x86   :  { %v161_v33 = vpop.xlane.xlu2 %160  ;;  %v174_v35 = vperm.slane %v151_v31, %v173_v29 }
  0x87   :  { %v188_v39 = vperm.slane %v161_v33, %v177_v34  ;;  %v187_v40 = vsel %vm175_vm0, %v186_v32, %v185_v36 }
  0x88   :  { %v176_v41 = vsel %vm175_vm0, %v174_v35, %v172_v38 }
  0x89   :  { %v189_v46 = vsel %vm179_vm1, %v188_v39, %v187_v40  ;;  %v180_v49 = vsel %vm179_vm1, %v178_v43, %v176_v41 }
  0x8c   :  { %v163_v42 = vpop.xlane.xlu1 %162 }
  0x8d   :  { %v190_v44 = vperm.slane %v163_v42, %v181_v37  ;;  %v155_v45 = vpop.xlane.xlu0 %154 }
  0x8e   :  { %v182_v47 = vperm.slane %v155_v45, %v181_v37 }
  0x8f   :  { %v191_v48 = vsel %vm183_vm2, %v190_v44, %v189_v46 }
  0x90   :  { %v184_v50 = vsel %vm183_vm2, %v182_v47, %v180_v49 }
  0x91   :  { %v193_v51 = vsel %vm192_vm3, %v191_v48, %v184_v50 }
  0x92   :  { %196 = vst.msk [vmem:[#allocation6] sm:$0x3] %vm195_vm4, %v193_v51 }
  0x93   :  { %207 = dma.vmem_to_hbm [thread:$0]  %s203_s13, 32, %s205_s16, [#allocation5]  }
  0x94   :  { %270 = dma.done.wait [#allocation5], 32  }
  0x95   :  { %271 = vsyncadd [#allocation5], 4294967264 }
  0x96   :  { %212 = vsyncpa [#allocation4], 1 }
  0x97   :  { %213 = vsyncpa [#allocation5], 1 }

</bundles_post_ra>
